<compile_context>
chip_gen: v7x
topology: tpu7x:2x2x1
jax: 0.10.0
libtpu: 0.0.40
codegen_flags: <defaults>
</compile_context>

<pallas_src>
import jax
import jax.numpy as jnp
from jax import lax
from jax.experimental import pallas as pl
from jax.experimental.pallas import tpu as pltpu


def _make_kernel(nb, L, L_pad, Di, th, n_h, trans_dtype, approx_recip):
    """Build the fused gated-tanh attention kernel with static config baked in."""
    cast_trans = jnp.dtype(trans_dtype) != jnp.dtype(jnp.float32)

    def kernel(img_ref, w_ref, qb_ref, wl_ref, blc_ref, out_ref, acc_ref):
        # img_ref : (nb, L_pad, Di)   image features (compute dtype)
        # w_ref   : (Di, 2*th)        fused per-H-tile [w_fa_img | w_gate_img]
        # qb_ref  : (nb, 1, 2*th)     hoisted per-batch q-side rows (f32)
        # wl_ref  : (1, th)           lc weight tile (f32)
        # blc_ref : (1, 1)            lc bias scalar (SMEM, f32)
        # out_ref : (1, nb, L_pad)    attention weights (written on last H tile)
        # acc_ref : (nb, L_pad) f32   raw-logit accumulator over H tiles
        h_idx = pl.program_id(1)

        @pl.when(h_idx == 0)
        def _init():
            acc_ref[...] = jnp.zeros_like(acc_ref)

        # One fused GEMM for both gates on an (nb*L_pad, Di) LHS so the MXU is
        # fed nb*L_pad rows.  The reshapes only split/merge the leading dim
        # (L_pad % 8 == 0), so they are layout no-ops.
        lhs = img_ref[...].reshape(nb * L_pad, Di)
        y = jnp.dot(lhs, w_ref[...], preferred_element_type=jnp.float32)
        y = y.reshape(nb, L_pad, 2 * th) + qb_ref[...]        # per-batch bias

        yf = y[..., :th]
        yg = y[..., th:]
        if cast_trans:
            # bf16 transcendentals (v6e/v7x): EUP is the saturating slot here.
            yf = yf.astype(trans_dtype)
            yg = yg.astype(trans_dtype)
        gated = jnp.tanh(yf) * jax.nn.sigmoid(yg)             # (nb, L_pad, th)

        # lc projection (H -> 1): VPU multiply + lane reduce, accumulated over
        # H tiles in f32 (exact: elementwise in H followed by a sum over H).
        acc_ref[...] += jnp.sum(gated.astype(jnp.float32) * wl_ref[...], axis=-1)

        @pl.when(h_idx == n_h - 1)
        def _finalize():
            raw = acc_ref[...] + blc_ref[0, 0]                # (nb, L_pad)
            if L_pad != L:
                col = lax.broadcasted_iota(jnp.int32, (nb, L_pad), 1)
                raw = jnp.where(col < L, raw, -jnp.inf)       # mask pad rows
            m = jnp.max(raw, axis=-1, keepdims=True)
            e = jnp.exp(raw - m)
            s = jnp.sum(e, axis=-1, keepdims=True)
            if approx_recip:
                attn = e * pl.reciprocal(s, approx=True)
            else:
                attn = e / s
            out_ref[0] = attn.astype(out_ref.dtype)

    return kernel


def concatenation_attention(image_feat, question_embedding, params, *,
                            th=None, nb=None, compute_dtype=jnp.bfloat16,
                            trans_dtype=None, expand=True):
    """ConcatenationAttention forward.

    image_feat:         (B, L, Di)
    question_embedding: (B, Dq)
    Returns softmax-over-locations attention weights broadcast to
    image_feat's shape (PyTorch module semantics) when expand=True, else the
    compact (B, L, 1) tensor.
    """
    B, L, Di = image_feat.shape
    H = params["w_fa_img"].shape[-1]

    compute_dtype = jnp.dtype(compute_dtype)
    if trans_dtype is None:
        # bf16 transcendentals on v6e/v7x; pass trans_dtype=jnp.float32 on v5e.
        trans_dtype = jnp.bfloat16 if compute_dtype == jnp.dtype(jnp.bfloat16) else jnp.float32
    approx_recip = compute_dtype != jnp.dtype(jnp.float32)
    w_itemsize = compute_dtype.itemsize

    # ---- VMEM budget (128 MiB on v5e/v6e, 64 MiB on v7x) --------------------
    try:
        vmem_cap = int(getattr(pltpu.get_tpu_info(), "vmem_capacity_bytes",
                               128 * 1024 * 1024))
    except Exception:
        vmem_cap = 128 * 1024 * 1024
    vmem_limit = min(int(vmem_cap * 0.8), 100 * 1024 * 1024)

    # ---- H tiling: prefer fully resident fused weights (fetched once) -------
    weight_budget = int(vmem_limit * 0.45)
    if th is None:
        if Di * 2 * H * w_itemsize <= weight_budget or H % 128 != 0:
            th = H
        else:
            th = H
            for cand in (2048, 1024, 512, 256, 128):
                if H % cand == 0 and Di * 2 * cand * w_itemsize * 2 <= weight_budget:
                    th = cand
                    break
    assert H % th == 0, "hidden size must be divisible by the H tile"
    n_h = H // th
    resident = (n_h == 1)       # weight block index constant across the grid

    # ---- batch tiling: fill the MXU with nb*L_pad rows per step -------------
    L_pad = ((L + 7) // 8) * 8
    if nb is None:
        row_target = 512
        nb_cap = max(1, row_target // L_pad)
        img_budget = int(vmem_limit * 0.25)
        per_b = L_pad * (Di * w_itemsize * 2        # image block (double-buffered)
                         + 2 * th * 4 + th * 4)     # f32 y / gated intermediates
        nb_cap = max(1, min(nb_cap, img_budget // max(per_b, 1)))
        nb = 1
        for d in range(1, B + 1):
            if B % d == 0 and d <= nb_cap:
                nb = d
        # Keep >= 2 grid steps along the batch axis (v7x megacore) when possible.
        if nb == B and B > 1:
            for d in range(B - 1, 0, -1):
                if B % d == 0:
                    nb = d
                    break
    assert B % nb == 0, "batch must be divisible by the batch tile"

    # ---- operand packing (tiny GEMMs / packing left to XLA in the wrapper) --
    # Hoisted question-side projections + biases, packed per H tile so that
    # block h along the last axis is [fa_tile_h | gate_tile_h].
    qb_f = (question_embedding @ params["w_fa_txt"] + params["b_fa"]).astype(jnp.float32)
    qb_g = (question_embedding @ params["w_gate_txt"] + params["b_gate"]).astype(jnp.float32)
    qb = jnp.concatenate([qb_f.reshape(B, n_h, th),
                          qb_g.reshape(B, n_h, th)], axis=-1).reshape(B, 1, 2 * H)

    # Fused image-path weights, interleaved per H tile (same layout as qb).
    w_img = jnp.concatenate(
        [params["w_fa_img"].reshape(Di, n_h, th),
         params["w_gate_img"].reshape(Di, n_h, th)], axis=-1
    ).reshape(Di, 2 * H).astype(compute_dtype)

    img = image_feat
    if L_pad != L:
        img = jnp.pad(img, ((0, 0), (0, L_pad - L), (0, 0)))
    img = img.astype(compute_dtype)

    wl = params["w_lc"].reshape(1, H).astype(jnp.float32)
    blc = params["b_lc"].reshape(1, 1).astype(jnp.float32)

    # Constant (resident) blocks never change -> single buffer.
    if resident:
        w_spec = pl.BlockSpec((Di, 2 * th), lambda b, h: (0, h),
                              pipeline_mode=pl.Buffered(1))
        wl_spec = pl.BlockSpec((1, th), lambda b, h: (0, h),
                               pipeline_mode=pl.Buffered(1))
    else:
        w_spec = pl.BlockSpec((Di, 2 * th), lambda b, h: (0, h))
        wl_spec = pl.BlockSpec((1, th), lambda b, h: (0, h))

    kernel = _make_kernel(nb, L, L_pad, Di, th, n_h, trans_dtype, approx_recip)

    out = pl.pallas_call(
        kernel,
        out_shape=jax.ShapeDtypeStruct((B // nb, nb, L_pad), jnp.float32),
        grid_spec=pltpu.PrefetchScalarGridSpec(
            num_scalar_prefetch=0,
            grid=(B // nb, n_h),                                  # reduction (H) axis last
            in_specs=[
                pl.BlockSpec((nb, L_pad, Di), lambda b, h: (b, 0, 0)),   # image block
                w_spec,                                                   # fused gate weights
                pl.BlockSpec((nb, 1, 2 * th), lambda b, h: (b, 0, h)),    # fused q-side rows
                wl_spec,                                                  # lc weight row
                pl.BlockSpec(memory_space=pltpu.MemorySpace.SMEM),        # lc bias scalar
            ],
            out_specs=pl.BlockSpec((1, nb, L_pad), lambda b, h: (b, 0, 0)),
            scratch_shapes=[pltpu.VMEM((nb, L_pad), jnp.float32)],        # raw-logit acc
        ),
        compiler_params=pltpu.CompilerParams(
            dimension_semantics=("parallel", "arbitrary"),
            vmem_limit_bytes=vmem_limit),
    )(img, w_img, qb, wl, blc)

    attn = out.reshape(B, L_pad)[:, :L]                          # (B, L)
    if expand:
        # PyTorch module semantics: expand_as(image_feat).
        # TODO(synk): callers that immediately multiply by image_feat should use
        # expand=False (compact (B, L, 1)) so XLA fuses the broadcast instead of
        # materializing a B*L*Di tensor in HBM.
        return jnp.broadcast_to(attn[:, :, None], (B, L, Di)).astype(image_feat.dtype)
    return attn[:, :, None].astype(image_feat.dtype)


def _reference(image_feat, question_embedding, params):
    """Pure-JAX reference mirroring the PyTorch forward."""
    B, L, Di = image_feat.shape
    q_exp = jnp.broadcast_to(question_embedding[:, None, :],
                             (B, L, question_embedding.shape[-1]))
    x = jnp.concatenate([image_feat, q_exp], axis=2)
    w_fa = jnp.concatenate([params["w_fa_img"], params["w_fa_txt"]], axis=0)
    w_gate = jnp.concatenate([params["w_gate_img"], params["w_gate_txt"]], axis=0)
    yf = jnp.tanh(x @ w_fa + params["b_fa"][0])
    yg = jax.nn.sigmoid(x @ w_gate + params["b_gate"][0])
    h = yf * yg
    raw = h @ params["w_lc"] + params["b_lc"][0, 0]              # (B, L, 1)
    attn = jax.nn.softmax(raw, axis=1)
    return jnp.broadcast_to(attn, image_feat.shape)


def init_params(key, image_feat_dim, txt_dim, hidden_size):
    # weight_norm in the original module is only a reparameterization; the
    # forward pass is equivalent to plain dense weights (in_features, out_features).
    ks = jax.random.split(key, 6)
    s = 0.05
    return {
        "w_fa_img":   s * jax.random.normal(ks[0], (image_feat_dim, hidden_size), jnp.float32),
        "w_fa_txt":   s * jax.random.normal(ks[1], (txt_dim, hidden_size), jnp.float32),
        "b_fa":       jnp.zeros((1, hidden_size), jnp.float32),
        "w_gate_img": s * jax.random.normal(ks[2], (image_feat_dim, hidden_size), jnp.float32),
        "w_gate_txt": s * jax.random.normal(ks[3], (txt_dim, hidden_size), jnp.float32),
        "b_gate":     jnp.zeros((1, hidden_size), jnp.float32),
        "w_lc":       s * jax.random.normal(ks[4], (hidden_size, 1), jnp.float32),
        "b_lc":       0.01 * jnp.ones((1, 1), jnp.float32),
    }


if __name__ == "__main__":
    key = jax.random.PRNGKey(0)
    k_img1, k_q1, k_p1, k_img2, k_q2, k_p2 = jax.random.split(key, 6)

    # Case 1: f32 compute, forced H tiling (th < H) -> exercises the H-tiled
    # accumulator / init-finalize path with a tight numerical check.
    B, L, Di, Dq, H = 2, 16, 32, 32, 256
    image_feat = jax.random.normal(k_img1, (B, L, Di), jnp.float32)
    question_embedding = jax.random.normal(k_q1, (B, Dq), jnp.float32)
    params = init_params(k_p1, Di, Dq, H)
    ref = _reference(image_feat, question_embedding, params)
    out = concatenation_attention(image_feat, question_embedding, params,
                                  th=128, compute_dtype=jnp.float32)
    out = jax.block_until_ready(out)
    assert out.shape == ref.shape
    assert jnp.allclose(out, ref, atol=3e-5, rtol=1e-4), \
        float(jnp.max(jnp.abs(out - ref)))

    # Case 2: default bf16 path -> resident fused weights (th=H, Buffered(1)),
    # nb-batched grid steps, and L not a multiple of 8 (pad + softmax mask).
    B, L, Di, Dq, H = 4, 20, 64, 48, 256
    image_feat = jax.random.normal(k_img2, (B, L, Di), jnp.float32)
    question_embedding = jax.random.normal(k_q2, (B, Dq), jnp.float32)
    params = init_params(k_p2, Di, Dq, H)
    ref = _reference(image_feat, question_embedding, params)
    out = concatenation_attention(image_feat, question_embedding, params)
    out = jax.block_until_ready(out)
    assert out.shape == ref.shape
    assert jnp.allclose(out, ref, atol=2e-2, rtol=2e-2), \
        float(jnp.max(jnp.abs(out - ref)))

    print("KERNEL_OK")
</pallas_src>

<mosaic_0001>
module attributes {stable_mosaic.version = 11 : i64} {
  func.func @kernel(%arg0: i32, %arg1: i32, %arg2: memref<1x16x32xf32, #tpu.memory_space<vmem>>, %arg3: memref<32x256xf32, #tpu.memory_space<vmem>>, %arg4: memref<1x1x256xf32, #tpu.memory_space<vmem>>, %arg5: memref<1x128xf32, #tpu.memory_space<vmem>>, %arg6: memref<1x1xf32, #tpu.memory_space<smem>>, %arg7: memref<1x1x16xf32, #tpu.memory_space<vmem>>, %arg8: memref<1x16xf32, #tpu.memory_space<vmem>>) attributes {dimension_semantics = [#tpu.dimension_semantics<parallel>, #tpu.dimension_semantics<arbitrary>], iteration_bounds = array<i64: 2, 2>, scalar_prefetch = 0 : i64, scratch_operands = 1 : i64, tpu.core_type = #tpu.core_type<tc>, window_params = [{transform_indices = @transform_0, window_bounds = array<i64: 1, 16, 32>}, {transform_indices = @transform_1, window_bounds = array<i64: 32, 256>}, {transform_indices = @transform_2, window_bounds = array<i64: 1, 1, 256>}, {transform_indices = @transform_3, window_bounds = array<i64: 1, 128>}, {transform_indices = @transform_4, window_bounds = array<i64: 1, 1>}, {transform_indices = @transform_5, window_bounds = array<i64: 1, 1, 16>}]} {
    %c0_i32 = arith.constant 0 : i32
    %0 = arith.cmpi eq, %arg1, %c0_i32 : i32
    %1 = arith.extui %0 : i1 to i32
    %c0_i32_0 = arith.constant 0 : i32
    %2 = arith.cmpi ne, %1, %c0_i32_0 : i32
    scf.if %2 {
      %cst_17 = arith.constant 0.000000e+00 : f32
      %31 = vector.broadcast %cst_17 : f32 to vector<1x16xf32>
      %c0_18 = arith.constant 0 : index
      %c0_19 = arith.constant 0 : index
      %32 = vector.load %arg8[%c0_18, %c0_19] : memref<1x16xf32, #tpu.memory_space<vmem>>, vector<1x16xf32>
      tpu.vector_store %arg8[%c0_18, %c0_19], %31 {strides = array<i32>} : memref<1x16xf32, #tpu.memory_space<vmem>>, vector<1x16xf32>,
    } else {
    }
    %c0 = arith.constant 0 : index
    %c0_1 = arith.constant 0 : index
    %c0_2 = arith.constant 0 : index
    %3 = vector.load %arg2[%c0, %c0_1, %c0_2] : memref<1x16x32xf32, #tpu.memory_space<vmem>>, vector<1x16x32xf32>
    %4 = vector.shape_cast %3 : vector<1x16x32xf32> to vector<16x32xf32>
    %c0_3 = arith.constant 0 : index
    %c0_4 = arith.constant 0 : index
    %5 = vector.load %arg3[%c0_3, %c0_4] : memref<32x256xf32, #tpu.memory_space<vmem>>, vector<32x256xf32>
    %cst = arith.constant dense<0.000000e+00> : vector<16x256xf32>
    %6 = tpu.matmul %4, %5, %cst {dimension_numbers = #tpu.dot_dimension_numbers<[1], [0], [0], [1], [0, 0, 1, 1], [], []>} : vector<16x32xf32>, vector<32x256xf32>, vector<16x256xf32> -> vector<16x256xf32>
    %7 = vector.shape_cast %6 : vector<16x256xf32> to vector<1x16x256xf32>
    %c0_5 = arith.constant 0 : index
    %c0_6 = arith.constant 0 : index
    %c0_7 = arith.constant 0 : index
    %8 = vector.load %arg4[%c0_5, %c0_6, %c0_7] : memref<1x1x256xf32, #tpu.memory_space<vmem>>, vector<1x1x256xf32>
    %9 = vector.broadcast %8 : vector<1x1x256xf32> to vector<1x16x256xf32>
    %10 = arith.addf %7, %9 : vector<1x16x256xf32>
    %11 = vector.extract_strided_slice %10 {offsets = [0, 0, 0], sizes = [1, 16, 128], strides = [1, 1, 1]} : vector<1x16x256xf32> to vector<1x16x128xf32>
    %12 = vector.extract_strided_slice %10 {offsets = [0, 0, 128], sizes = [1, 16, 128], strides = [1, 1, 1]} : vector<1x16x256xf32> to vector<1x16x128xf32>
    %13 = math.tanh %11 : vector<1x16x128xf32>
    %14 = arith.negf %12 : vector<1x16x128xf32>
    %15 = math.exp %14 : vector<1x16x128xf32>
    %cst_8 = arith.constant 1.000000e+00 : f32
    %16 = vector.broadcast %cst_8 : f32 to vector<1x16x128xf32>
    %17 = arith.addf %16, %15 : vector<1x16x128xf32>
    %18 = arith.divf %16, %17 : vector<1x16x128xf32>
    %19 = arith.mulf %13, %18 : vector<1x16x128xf32>
    %c0_9 = arith.constant 0 : index
    %c0_10 = arith.constant 0 : index
    %20 = vector.load %arg8[%c0_9, %c0_10] : memref<1x16xf32, #tpu.memory_space<vmem>>, vector<1x16xf32>
    %c0_11 = arith.constant 0 : index
    %c0_12 = arith.constant 0 : index
    %21 = vector.load %arg5[%c0_11, %c0_12] : memref<1x128xf32, #tpu.memory_space<vmem>>, vector<1x128xf32>
    %22 = vector.shape_cast %21 : vector<1x128xf32> to vector<1x1x128xf32>
    %23 = vector.broadcast %22 : vector<1x1x128xf32> to vector<1x16x128xf32>
    %24 = arith.mulf %19, %23 : vector<1x16x128xf32>
    %cst_13 = arith.constant dense<0.000000e+00> : vector<1x16xf32>
    %25 = vector.multi_reduction <add>, %24, %cst_13 [2] : vector<1x16x128xf32> to vector<1x16xf32>
    %26 = arith.addf %20, %25 : vector<1x16xf32>
    %c0_14 = arith.constant 0 : index
    %c0_15 = arith.constant 0 : index
    %27 = vector.load %arg8[%c0_14, %c0_15] : memref<1x16xf32, #tpu.memory_space<vmem>>, vector<1x16xf32>
    tpu.vector_store %arg8[%c0_14, %c0_15], %26 {strides = array<i32>} : memref<1x16xf32, #tpu.memory_space<vmem>>, vector<1x16xf32>,
    %c1_i32 = arith.constant 1 : i32
    %28 = arith.cmpi eq, %arg1, %c1_i32 : i32
    %29 = arith.extui %28 : i1 to i32
    %c0_i32_16 = arith.constant 0 : i32
    %30 = arith.cmpi ne, %29, %c0_i32_16 : i32
    scf.if %30 {
      %c0_17 = arith.constant 0 : index
      %c0_18 = arith.constant 0 : index
      %31 = vector.load %arg8[%c0_17, %c0_18] : memref<1x16xf32, #tpu.memory_space<vmem>>, vector<1x16xf32>
      %c0_19 = arith.constant 0 : index
      %c0_20 = arith.constant 0 : index
      %32 = memref.load %arg6[%c0_19, %c0_20] : memref<1x1xf32, #tpu.memory_space<smem>>
      %33 = vector.broadcast %32 : f32 to vector<1x16xf32>
      %34 = arith.addf %31, %33 : vector<1x16xf32>
      %cst_21 = arith.constant dense<0xFF800000> : vector<1xf32>
      %35 = vector.multi_reduction <maximumf>, %34, %cst_21 [1] : vector<1x16xf32> to vector<1xf32>
      %36 = vector.shape_cast %35 : vector<1xf32> to vector<1x1xf32>
      %37 = vector.broadcast %36 : vector<1x1xf32> to vector<1x16xf32>
      %38 = arith.subf %34, %37 : vector<1x16xf32>
      %39 = math.exp %38 : vector<1x16xf32>
      %cst_22 = arith.constant dense<0.000000e+00> : vector<1xf32>
      %40 = vector.multi_reduction <add>, %39, %cst_22 [1] : vector<1x16xf32> to vector<1xf32>
      %41 = vector.shape_cast %40 : vector<1xf32> to vector<1x1xf32>
      %42 = vector.broadcast %41 : vector<1x1xf32> to vector<1x16xf32>
      %43 = arith.divf %39, %42 : vector<1x16xf32>
      %c0_23 = arith.constant 0 : index
      %c0_24 = arith.constant 0 : index
      %c0_25 = arith.constant 0 : index
      %44 = vector.load %arg7[%c0_23, %c0_24, %c0_25] : memref<1x1x16xf32, #tpu.memory_space<vmem>>, vector<1x1x16xf32>
      %45 = vector.shape_cast %44 : vector<1x1x16xf32> to vector<1x16xf32>
      %46 = vector.shape_cast %43 : vector<1x16xf32> to vector<1x1x16xf32>
      tpu.vector_store %arg7[%c0_23, %c0_24, %c0_25], %46 {strides = array<i32>} : memref<1x1x16xf32, #tpu.memory_space<vmem>>, vector<1x1x16xf32>,
    } else {
    }
    return
  }
  func.func @transform_0(%arg0: i32, %arg1: i32) -> (i32, i32, i32) {
    %c0_i32 = arith.constant 0 : i32
    %c0_i32_0 = arith.constant 0 : i32
    %c0_i32_1 = arith.constant 0 : i32
    return %arg0, %c0_i32, %c0_i32_0 : i32, i32, i32
  }
  func.func @transform_1(%arg0: i32, %arg1: i32) -> (i32, i32) {
    %c0_i32 = arith.constant 0 : i32
    %c0_i32_0 = arith.constant 0 : i32
    return %c0_i32, %arg1 : i32, i32
  }
  func.func @transform_2(%arg0: i32, %arg1: i32) -> (i32, i32, i32) {
    %c0_i32 = arith.constant 0 : i32
    %c0_i32_0 = arith.constant 0 : i32
    return %arg0, %c0_i32, %arg1 : i32, i32, i32
  }
  func.func @transform_3(%arg0: i32, %arg1: i32) -> (i32, i32) {
    %c0_i32 = arith.constant 0 : i32
    %c0_i32_0 = arith.constant 0 : i32
    return %c0_i32, %arg1 : i32, i32
  }
  func.func @transform_4(%arg0: i32, %arg1: i32) -> (i32, i32) {
    %c0_i32 = arith.constant 0 : i32
    %c0_i32_0 = arith.constant 0 : i32
    %c0_i32_1 = arith.constant 0 : i32
    return %c0_i32, %c0_i32_0 : i32, i32
  }
  func.func @transform_5(%arg0: i32, %arg1: i32) -> (i32, i32, i32) {
    %c0_i32 = arith.constant 0 : i32
    %c0_i32_0 = arith.constant 0 : i32
    %c0_i32_1 = arith.constant 0 : i32
    return %arg0, %c0_i32, %c0_i32_0 : i32, i32, i32
  }
}

</mosaic_0001>

<bundles_post_ra>
// kernel: tpu_custom_call.1
= control target key start
LH: loop header
LB: loop body
LE: loop exit
PB: predicated region body
PF: predicated region fallthrough
CT: control target
= control target key end

     0   :  { %s1933_s0 = inlined_call_operand.hbm [shape: f32[2,16,32], index: 0, kind: input, shape index: {}]   ;;  %s1934_s1 = inlined_call_operand.hbm [shape: f32[32,512], index: 1, kind: input, shape index: {}]   ;;  %s1935_s2 = inlined_call_operand.hbm [shape: f32[2,1,512], index: 2, kind: input, shape index: {}]   ;;  %s1936_s3 = inlined_call_operand.hbm [shape: f32[1,256], index: 3, kind: input, shape index: {}]   ;;  %s1937_s4 = inlined_call_operand.<no memory space> [shape: f32[1,1], index: 4, kind: input, shape index: {}]   ;;  %s1938_s5 = inlined_call_operand.hbm [shape: f32[2,1,16], index: 5, kind: output, shape index: {}]  }
   0x1   :  { %1961 = sst [smem:[#allocation29_spill]] %s1934_s1 }
   0x2   :  { %1962 = sst [smem:[#allocation30_spill]] %s1938_s5 }
   0x3   :  { %10 = sst [smem:[#allocation3]] %s1937_s4 }
   0x4   :  { %11 = vsyncpa [#allocation5], 0 }
   0x5   :  { %13 = vsyncpa [#allocation5 + $0x1], 0 }
   0x6   :  { %14 = vsyncpa [#allocation8], 0 }
   0x7   :  { %16 = vsyncpa [#allocation8 + $0x1], 0 }
   0x8   :  { %17 = vsyncpa [#allocation11], 0 }
   0x9   :  { %19 = vsyncpa [#allocation11 + $0x1], 0 }
   0xa   :  { %20 = vsyncpa [#allocation6], 0 }
   0xb   :  { %22 = vsyncpa [#allocation6 + $0x1], 0  ;;  %s1431_s20 = smov 0   ;;  %s1433_s21 = smov 0  }
   0xc   :  { %s1435_s22 = smov 0   ;;  %s1437_s23 = smov 0  }
   0xd   :  { %s1439_s24 = smov 0   ;;  %s1441_s25 = smov 0  }
   0xe   :  { %s1443_s4 = smov 0   ;;  %s1445_s26 = smov 0  }
   0xf   :  { %s1447_s27 = smov 0   ;;  %s1449_s28 = smov 0  }
  0x10   :  { %s1451_s29 = smov 0   ;;  %s1453_s30 = smov 0  }
  0x11   :  { %s1455_s6 = smov 0   ;;  %s1457_s7 = smov 0  }
  0x12 LB: > { %1963 = sst [smem:[#allocation18_spill]] %s1346_s24  ;;  %s1939_s8 = sadd.s32 1, %s1374_s30  ;;  %s1382_s7 = sphi %s1457_s7, %s28_s7   ;;  %s1378_s6 = sphi %s1455_s6, %s2031_s6   ;;  %s1374_s30 = sphi %s1453_s30, %s2030_s30   ;;  %s1370_s29 = sphi %s1451_s29, %s2029_s29   ;;  %s1366_s28 = sphi %s1449_s28, %s2028_s28   ;;  %s1362_s27 = sphi %s1447_s27, %s2027_s27   ;;  %s1358_s26 = sphi %s1445_s26, %s2026_s26   ;;  %s1354_s4 = sphi %s1443_s4, %s2025_s4   ;;  %s1350_s25 = sphi %s1441_s25, %s2024_s25   ;;  %s1346_s24 = sphi %s1439_s24, %s2023_s24   ;;  %s1342_s23 = sphi %s1437_s23, %s2015_s23   ;;  %s1338_s22 = sphi %s1435_s22, %s2022_s22   ;;  %s1334_s21 = sphi %s1433_s21, %s2021_s21   ;;  %s1330_s20 = sphi %s1431_s20, %s2020_s20  }
  0x13   : > { %1964 = sst [smem:[#allocation19_spill]] %s1354_s4  ;;  %p1942_p0 = scmp.eq.s32.totalorder %s1382_s7, 0 }
  0x14   : > { %1965 = sst [smem:[#allocation20_spill]] %s1362_s27  ;;  %p1505_p1 = scmp.ge.s32.totalorder %s1939_s8, 2 }
  0x15   : > { %1966 = sst [smem:[#allocation21_spill]] %s1366_s28  ;;  %p80_p2 = scmp.ne.s32.totalorder %s1350_s25, %s1346_s24 }
  0x16   : > { %1967 = sst [smem:[#allocation22_spill]] %s1370_s29  ;;  %p1941_p4 = scmp.lt.s32.totalorder %s1382_s7, 4 }
  0x17   : > { %p82_p5 = por %p80_p2, %p1942_p0  ;;  %s235_s11 = sand.u32 1, %s1382_s7  }
  0x18   : > { %s1519_s12 = sand.u32 1, %s1350_s25   ;;  %s923_s14 = sshll.u32 %s1374_s30, 8 }
  0x19   : > { %s900_s13 = sshll.u32 %s1519_s12, 6  ;;  %s1969_s1 = sld [smem:[#allocation29_spill]] }
  0x1a   : > { %s239_s18 = scalar_lea.vmem [#allocation7], %s900_s13  ;;  %p1530_p6 = pnand %p1941_p4, %p82_p5 }
  0x1b   : > { %s246_s19 = sshll.u32 %s239_s18, 4  ;;  %s1537_s8 = scalar_lea.sflag [#allocation8], %s235_s11  ;;  %s1534_s19 = int_to_ptr.vmem [resolvable:$true] %s246_s19 }
  0x1c   : > { %s1970_s10 = scalar_select %p1530_p6, 1, 0 }
  0x1d   : > { %p1943_p9 = pneg %p1530_p6 }
  0x1f   : > { %s1526_s17 = scalar_lea.hbm %s1969_s1, %s923_s14  ;;  %s1109_s16 = scalar_lea.hbm %s1969_s1, 2048 }
  0x20   : > { %s1104_s14 = scalar_lea.hbm %s1526_s17, 1024  ;;  %p1110_p12 = scmp.lt.u32.totalorder %s1526_s17, %s1969_s1 }
  0x21   : > { %p1105_p8 = scmp.ne.s32.totalorder %s1526_s17, %s1104_s14  ;;  %p1111_p13 = scmp.lt.u32.totalorder %s1109_s16, %s1104_s14 }
  0x22   : > { %p1113_p5 = scmp.lt.u32.totalorder %s1104_s14, %s1526_s17 }
  0x23   : > { %p1107_p10 = pnand %p1943_p9, %p1105_p8  ;;  %p1112_p2 = por %p1111_p13, %p1110_p12 }
  0x25   : > { %p1108_p11 = pneg %p1107_p10  ;;  %p1114_p4 = por %p1113_p5, %p1112_p2 }
  0x27   : > { %p1115_p3 = pnand %p1114_p4, %p1108_p11 }
  0x29   : > { %1118 = shalt.err (!%p1115_p3)
}
  0x2a   : > { %s1119_s11 = scalar_lea.vmem %s1534_s19, 1024  ;;  %s1384_s13 = smov [#allocation7]  }
  0x2b   : > { %p1120_p8 = scmp.ne.s32.totalorder %s1534_s19, %s1119_s11  ;;  %s1124_s15 = sshll.u32 %s1384_s13, 4  ;;  %s1125_s15 = int_to_ptr.vmem [resolvable:$false] %s1124_s15 }
  0x2c   : > { %s1126_s5 = scalar_lea.vmem %s1125_s15, 2048  ;;  %p1127_p7 = scmp.lt.s32.totalorder %s1534_s19, %s1125_s15 }
  0x2d   : > { %p1122_p10 = pnand %p1120_p8, %p1943_p9  ;;  %p1128_p12 = scmp.lt.s32.totalorder %s1126_s5, %s1119_s11 }
  0x2f   : > { %p1123_p0 = pneg %p1122_p10  ;;  %p1129_p13 = por %p1128_p12, %p1127_p7 }
  0x31   : > { %p1130_p2 = pnand %p1129_p13, %p1123_p0 }
  0x33   : > { %1133 = shalt.err (!%p1130_p2)
}
  0x34   : > { %s1385_s14 = smov 512   ;;  %s1386_s16 = smov 256  }
  0x35   : > { %s1387_s18 = smov 16   ;;  %p292_p0 = scmp.lt.s32.totalorder %s1382_s7, 5 }
  0x36   : > { %952 = dma.hbm_to_vmem [thread:$0]  (!%p1530_p6), %s1526_s17, 1024, %s1534_s19, %s1537_s8, %s1385_s14, %s1386_s16, %s1387_s18  }
  0x37   : > { %p1971_p3 = scmp.ge.s32.totalorder %s1382_s7, 1  ;;  %s1573_s13 = sadd.s32 4294967295, %s1382_s7  }
  0x38   : > { %s894_s15 = sadd.s32 4294967294, %s1382_s7   ;;  %s40_s5 = sadd.s32 1, %s1378_s6 }
  0x39   : > { %p1568_p4 = pnand %p1971_p3, %p292_p0  ;;  %s47_s1 = sadd.s32 1, %s1362_s27 }
  0x3a   : > { %s2033_s5 = smov (!%p1505_p1, %s40_s5), %s1378_s6  ;;  %p54_p7 = scmp.ne.s32.totalorder %s1362_s27, %s1358_s26 }
  0x3b   : > { %s1972_s11 = scalar_select %p1568_p4, 1, 0 }
  0x3c   : > { %p60_p11 = scmp.ne.s32.totalorder %s1358_s26, %s1354_s4  ;;  %p42_p5 = scmp.ge.s32.totalorder %s2033_s5, 2 }
  0x3d   : > { %1973 = sst [smem:[#allocation23_spill]] %s1972_s11  ;;  %p1955_p8 = scmp.eq.s32.totalorder %s1573_s13, 0 }
  0x3e   : > { %p1974_p10 = scmp.eq.s32.totalorder %s1382_s7, 0  ;;  %p185_p13 = scmp.eq.s32.totalorder %s1573_s13, 3 }
  0x3f   : > { %s2035_s5 = smov (%p42_p5, %s2033_s5), 0  ;;  %p1600_p2 = por %p1955_p8, %p60_p11 }
  0x40   : > { %p1588_p12 = por %p1974_p10, %p54_p7  ;;  %1976 = sst [smem:[#allocation24_spill]] %s2035_s5 }
  0x41   : > { %s1977_s19 = scalar_select %p1600_p2, 1, 0 }
  0x42   : > { %p1979_p0 = scmp.ne.s32.totalorder %s1346_s24, %s1342_s23  ;;  %s1615_s16 = ssub.s32 %s1378_s6, %s2035_s5 }
  0x43   : > { %1978 = sst [smem:[#allocation25_spill]] %s1977_s19  ;;  %p1617_p10 = por %p185_p13, %p54_p7 }
  0x44   : > { %p1609_p3 = por %p1979_p0, %p1955_p8  ;;  %p45_p5 = scmp.eq.s32.totalorder %s1615_s16, 0 }
  0x45   : > { %s1982_s18 = scalar_select %p1617_p10, 1, 0 }
  0x46   : > { %s1980_s14 = scalar_select %p1609_p3, 1, 0 }
  0x47   : > { %p191_p9 = scmp.eq.s32.totalorder %s894_s15, 3  ;;  %s214_s29 = sand.u32 1, %s1362_s27  }
  0x48   : > { %1981 = sst [smem:[#allocation26_spill]] %s1980_s14  ;;  %s922_s28 = sshll.u32 %s1378_s6, 8 }
  0x49   : > { %s1625_s11 = scalar_select %p45_p5, %s1362_s27, %s47_s1  }
  0x4a   : > { %p1630_p2 = por %p191_p9, %p60_p11  ;;  %s897_s24 = sshll.u32 %s214_s29, 4 }
  0x4b   : > { %1983 = sst [smem:[#allocation27_spill]] %s1625_s11  ;;  %s1637_s19 = scalar_lea.hbm %s1933_s0, %s922_s28 }
  0x4c   : > { %s1984_s23 = scalar_select %p1630_p2, 1, 0 }
  0x4d   : > { %p1986_p7 = scmp.lt.s32.totalorder %s1382_s7, 4  ;;  %s218_s15 = scalar_lea.vmem [#allocation4], %s897_s24 }
  0x4e   : > { %1985 = sst [smem:[#allocation28_spill]] %s1984_s23  ;;  %s225_s11 = sshll.u32 %s218_s15, 4  ;;  %s1647_s11 = int_to_ptr.vmem [resolvable:$true] %s225_s11 }
  0x4f   : > { %p1643_p13 = pnand %p1986_p7, %p1588_p12  ;;  %s1649_s27 = scalar_lea.sflag [#allocation5], %s214_s29 }
  0x50   : > { %s1134_s28 = scalar_lea.hbm %s1637_s19, 256  ;;  %s1139_s14 = scalar_lea.hbm %s1933_s0, 512 }
  0x51   : > { %p1135_p9 = scmp.ne.s32.totalorder %s1637_s19, %s1134_s28  ;;  %p1136_p11 = pneg %p1643_p13 }
  0x52   : > { %p1140_p12 = scmp.lt.u32.totalorder %s1637_s19, %s1933_s0  ;;  %p1141_p7 = scmp.lt.u32.totalorder %s1139_s14, %s1134_s28 }
  0x53   : > { %p1137_p0 = pnand %p1136_p11, %p1135_p9  ;;  %p1143_p2 = scmp.lt.u32.totalorder %s1134_s28, %s1637_s19 }
  0x54   : > { %p1142_p8 = por %p1141_p7, %p1140_p12 }
  0x55   : > { %p1138_p5 = pneg %p1137_p0 }
  0x56   : > { %p1144_p10 = por %p1143_p2, %p1142_p8 }
  0x58   : > { %p1145_p3 = pnand %p1144_p10, %p1138_p5 }
  0x5a   : > { %1148 = shalt.err (!%p1145_p3)
}
  0x5b   : > { %s1149_s24 = scalar_lea.vmem %s1647_s11, 256  ;;  %s1388_s29 = smov [#allocation4]  }
  0x5c   : > { %p1150_p9 = scmp.ne.s32.totalorder %s1647_s11, %s1149_s24  ;;  %s1154_s15 = sshll.u32 %s1388_s29, 4  ;;  %s1155_s15 = int_to_ptr.vmem [resolvable:$false] %s1154_s15 }
  0x5d   : > { %s1156_s4 = scalar_lea.vmem %s1155_s15, 512  ;;  %p1157_p6 = scmp.lt.s32.totalorder %s1647_s11, %s1155_s15 }
  0x5e   : > { %p1152_p0 = pnand %p1150_p9, %p1136_p11  ;;  %p1158_p12 = scmp.lt.s32.totalorder %s1156_s4, %s1149_s24 }
  0x60   : > { %p1153_p4 = pneg %p1152_p0  ;;  %p1159_p7 = por %p1158_p12, %p1157_p6 }
  0x62   : > { %p1160_p8 = pnand %p1159_p7, %p1153_p4 }
  0x64   : > { %1163 = shalt.err (!%p1160_p8)
}
  0x65   : > { %s1389_s23 = smov 128   ;;  %s1390_s28 = smov 8  }
  0x66   : > { %949 = dma.hbm_to_vmem [thread:$0]  (!%p1643_p13), %s1637_s19, 256, %s1647_s11, %s1649_s27, %s1389_s23, %s1389_s23, %s1390_s28  }
  0x67   : > { %s101_s5 = sadd.s32 1, %s1338_s22  ;;  %s1988_s17 = sadd.s32 1, %s1374_s30 }
  0x68   : > { %s2037_s17 = smov (%p1505_p1, %s1988_s17), 0  ;;  %p108_p6 = scmp.ne.s32.totalorder %s1338_s22, %s1334_s21 }
  0x69   : > { %p114_p4 = scmp.ne.s32.totalorder %s1334_s21, %s1330_s20  ;;  %s70_s14 = ssub.s32 %s1374_s30, %s2037_s17 }
  0x6a   : > { %s258_s24 = sand.u32 1, %s1338_s22   ;;  %p71_p2 = scmp.eq.s32.totalorder %s70_s14, 0 }
  0x6b   : > { %s98_s29 = sor.u32 %s70_s14, %s1615_s16  ;;  %p1989_p10 = scmp.eq.s32.totalorder %s1382_s7, 0 }
  0x6c   : > { %p99_p3 = scmp.eq.s32.totalorder %s98_s29, 0  ;;  %s1990_s1 = sadd.s32 1, %s1350_s25 }
  0x6d   : > { %p110_p11 = por %p108_p6, %p1989_p10  ;;  %p1991_p13 = scmp.eq.s32.totalorder %s1573_s13, 0 }
  0x6e   : > { %s1697_s15 = scalar_select %p71_p2, %s1350_s25, %s1990_s1  }
  0x6f   : > { %s1700_s27 = scalar_select %p99_p3, %s1338_s22, %s101_s5  }
  0x70   : > { %p1704_p5 = por %p114_p4, %p1991_p13  ;;  %s903_s11 = sshll.u32 %s258_s24, 1 }
  0x71   : > { %s904_s20 = sshll.u32 %s1374_s30, 1  ;;  %s905_s19 = sshll.u32 %s1378_s6, 2 }
  0x72   : > { %s1992_s9 = scalar_select %p1704_p5, 1, 0 }
  0x73   : > { %s260_s4 = scalar_lea.vmem [#allocation9], %s903_s11  ;;  %s266_s28 = sadd.s32 %s905_s19, %s904_s20 }
  0x74   : > { %s270_s23 = sshll.u32 %s260_s4, 4  ;;  %s906_s16 = sshll.u32 %s266_s28, 4  ;;  %s1710_s23 = int_to_ptr.vmem [resolvable:$true] %s270_s23 }
  0x75   : > { %p1993_p1 = scmp.lt.s32.totalorder %s1382_s7, 4  ;;  %s268_s1 = scalar_lea.hbm %s1935_s2, %s906_s16 }
  0x76   : > { %s1164_s24 = scalar_lea.hbm %s268_s1, 32  ;;  %s1169_s19 = scalar_lea.hbm %s1935_s2, 128 }
  0x77   : > { %p1714_p9 = pnand %p1993_p1, %p110_p11  ;;  %p1165_p0 = scmp.ne.s32.totalorder %s268_s1, %s1164_s24 }
  0x78   : > { %p1170_p6 = scmp.lt.u32.totalorder %s268_s1, %s1935_s2  ;;  %p1171_p4 = scmp.lt.u32.totalorder %s1169_s19, %s1164_s24 }
  0x79   : > { %p1166_p12 = pneg %p1714_p9  ;;  %p1173_p3 = scmp.lt.u32.totalorder %s1164_s24, %s268_s1 }
  0x7a   : > { %p1172_p2 = por %p1171_p4, %p1170_p6 }
  0x7b   : > { %p1167_p7 = pnand %p1166_p12, %p1165_p0 }
  0x7c   : > { %p1174_p10 = por %p1173_p3, %p1172_p2 }
  0x7d   : > { %p1168_p8 = pneg %p1167_p7 }
  0x7f   : > { %p1175_p11 = pnand %p1174_p10, %p1168_p8 }
  0x81   : > { %1178 = shalt.err (!%p1175_p11)
}
  0x82   : > { %s1179_s16 = scalar_lea.vmem %s1710_s23, 32  ;;  %s1391_s5 = smov [#allocation9]  }
  0x83   : > { %p1180_p13 = scmp.ne.s32.totalorder %s1710_s23, %s1179_s16  ;;  %s1184_s29 = sshll.u32 %s1391_s5, 4  ;;  %s1185_s29 = int_to_ptr.vmem [resolvable:$false] %s1184_s29 }
  0x84   : > { %s1186_s11 = scalar_lea.vmem %s1185_s29, 64  ;;  %p1187_p7 = scmp.lt.s32.totalorder %s1710_s23, %s1185_s29 }
  0x85   : > { %p1182_p1 = pnand %p1180_p13, %p1166_p12  ;;  %p1188_p6 = scmp.lt.s32.totalorder %s1186_s11, %s1179_s16 }
  0x87   : > { %p1183_p0 = pneg %p1182_p1  ;;  %p1189_p4 = por %p1188_p6, %p1187_p7 }
  0x89   : > { %p1190_p2 = pnand %p1189_p4, %p1183_p0 }
  0x8b   : > { %1193 = shalt.err (!%p1190_p2)
}
  0x8c   : > { %955 = dma.hbm_to_vmem [thread:$0]  (!%p1714_p9), %s268_s1, 32, %s1710_s23, %s1537_s8  }
  0x8d   : > { %s907_s24 = sshll.u32 %s1374_s30, 4  ;;  %s280_s20 = scalar_lea.vmem [#allocation10], %s1519_s12 }
  0x8e   : > { %s287_s19 = sshll.u32 %s280_s20, 4  ;;  %s1747_s5 = scalar_lea.hbm %s1936_s3, %s907_s24  ;;  %s288_s19 = int_to_ptr.vmem [resolvable:$true] %s287_s19 }
  0x8f   : > { %s278_s14 = scalar_lea.sflag [#allocation11], %s1519_s12  ;;  %s1194_s16 = scalar_lea.hbm %s1747_s5, 16 }
  0x90   : > { %p1195_p12 = scmp.ne.s32.totalorder %s1747_s5, %s1194_s16  ;;  %p1995_p8 = scmp.ne.s32.totalorder %s1970_s10, 0 }
  0x91   : > { %s1199_s1 = scalar_lea.hbm %s1936_s3, 32  ;;  %p1200_p11 = scmp.lt.u32.totalorder %s1747_s5, %s1936_s3 }
  0x92   : > { %p1996_p3 = pneg %p1995_p8  ;;  %p1201_p13 = scmp.lt.u32.totalorder %s1199_s1, %s1194_s16 }
  0x93   : > { %p1203_p0 = scmp.lt.u32.totalorder %s1194_s16, %s1747_s5 }
  0x94   : > { %p1197_p10 = pnand %p1195_p12, %p1996_p3  ;;  %p1202_p1 = por %p1201_p13, %p1200_p11 }
  0x96   : > { %p1198_p9 = pneg %p1197_p10  ;;  %p1204_p7 = por %p1203_p0, %p1202_p1 }
  0x98   : > { %p1205_p6 = pnand %p1204_p7, %p1198_p9 }
  0x9a   : > { %1208 = shalt.err (!%p1205_p6)
}
  0x9b   : > { %s1209_s12 = scalar_lea.vmem %s288_s19, 16  ;;  %p1997_p2 = pmov %p1996_p3 }
  0x9c   : > { %p1210_p4 = scmp.ne.s32.totalorder %s288_s19, %s1209_s12  ;;  %s1392_s24 = smov [#allocation10]  }
  0x9d   : > { %s1214_s20 = sshll.u32 %s1392_s24, 4  ;;  %s1215_s20 = int_to_ptr.vmem [resolvable:$false] %s1214_s20 }
  0x9e   : > { %p1212_p12 = pnand %p1210_p4, %p1997_p2  ;;  %s1216_s4 = scalar_lea.vmem %s1215_s20, 32 }
  0x9f   : > { %p1217_p10 = scmp.lt.s32.totalorder %s288_s19, %s1215_s20  ;;  %p1218_p5 = scmp.lt.s32.totalorder %s1216_s4, %s1209_s12 }
  0xa0   : > { %p1213_p3 = pneg %p1212_p12 }
  0xa1   : > { %p1219_p11 = por %p1218_p5, %p1217_p10 }
  0xa3   : > { %p1220_p13 = pnand %p1219_p11, %p1213_p3 }
  0xa5   : > { %1223 = shalt.err (!%p1220_p13)
}
  0xa6   : > { %958 = dma.hbm_to_vmem [thread:$0]  (!%p1995_p8), %s1747_s5, 16, %s288_s19, %s278_s14  }
  0xa7   : > { %s1998_s28 = sld [smem:[#allocation23_spill]] }
  0xad   : > { %p1999_p9 = scmp.ne.s32.totalorder %s1998_s28, 0 }
  0xae   : > { %s2000_s16 = sld [smem:[#allocation25_spill]] (!%p1999_p9)  ;;  %s1772_s8 = sand.u32 (!%p1999_p9), 1, %s1358_s26  }
  0xaf   : > { %296 = sbr.rel (%p1999_p9) target bundleno = 1120 (0x460), region = 40  ;;  %s909_s23 = sshll.u32 (!%p1999_p9), %s1772_s8, 4 }
  0xb0   : > { %s299_s1 = scalar_lea.sflag (!%p1999_p9), [#allocation5], %s1772_s8  ;;  %s1776_s29 = scalar_lea.vmem (!%p1999_p9), [#allocation4], %s909_s23 }
  0xb4   : > { %p2001_p5 = scmp.ne.s32.totalorder (!%p1999_p9), %s2000_s16, 0 }
  0xb6   : > { %1309 = dma.done.wait (%p2001_p5), %s299_s1, 256  }
  0xb7   : > { %1311 = vsyncadd (%p2001_p5), %s299_s1, 4294967040  ;;  %s2002_s10 = sld [smem:[#allocation18_spill]]  ;;  %s2003_s19 = sld [smem:[#allocation26_spill]] }
  0xb8   : > { %s307_s5 = sand.u32 1, %s1573_s13  }
  0xb9   : > { %s308_s12 = scalar_lea.sflag [#allocation8], %s307_s5 }
  0xbd   : > { %s1784_s14 = sand.u32 1, %s2002_s10   ;;  %p2004_p8 = scmp.ne.s32.totalorder %s2003_s19, 0 }
  0xbe   : > { %s910_s11 = sshll.u32 %s1784_s14, 6 }
  0xbf   : > { %s1787_s24 = scalar_lea.vmem [#allocation7], %s910_s11 }
  0xc0   : > { %1313 = dma.done.wait (%p2004_p8), %s308_s12, 1024  }
  0xc1   : > { %1315 = vsyncadd (%p2004_p8), %s308_s12, 4294966272  ;;  %s318_s20 = sand.u32 1, %s1334_s21   ;;  %p2005_p1 = scmp.ne.s32.totalorder %s1992_s9, 0 }
  0xc2   : > { %s1794_s4 = sshll.u32 %s318_s20, 1 }
  0xc3   : > { %s320_s28 = scalar_lea.vmem [#allocation9], %s1794_s4 }
  0xc4   : > { %1317 = dma.done.wait (%p2005_p1), %s308_s12, 32  }
  0xc5   : > { %1319 = vsyncadd (%p2005_p1), %s308_s12, 4294967264  ;;  %s326_s13 = scalar_lea.sflag [#allocation11], %s1784_s14  ;;  %s328_s16 = scalar_lea.vmem [#allocation10], %s1784_s14 }
  0xc6   : > { %1321 = dma.done.wait (%p2004_p8), %s326_s13, 16  }
  0xc7   : > { %1323 = vsyncadd (%p2004_p8), %s326_s13, 4294967280  ;;  %s367_s23 = scalar_lea.vmem [#allocation12], %s1772_s8  ;;  %s2006_s1 = sld [smem:[#allocation21_spill]] }
  0xcd   : > { %p912_p0 = scmp.ne.s32.totalorder %s2006_s1, 0 }
  0xce   : > { %vm374_vm0 = vcmask (!%p912_p0), 122880   ;;  %v1393_v0 = vmov (!%p912_p0), 0.0  }
  0xcf   : > { %373 = sbr.rel (%p912_p0) target bundleno = 214 (0xd6), region = 60  ;;  %375 = vst.msk [vmem:[#allocation2] sm:$0x1] (!%p912_p0), %vm374_vm0, %v1393_v0 }
  0xd6 PF: > { %v379_v1 = vld [vmem:[%s1787_s24 + $0x8] sm:$0xff]  ;;  %v381_v2 = vld [vmem:[%s1787_s24 + $0x18] sm:$0xff]  ;;  %v378_v3 = vld [vmem:[%s1787_s24] sm:$0xff]  ;;  %v1394_v8 = vmov 0.0   ;;  %vm386_vm1 = vcmask 261120   ;;  %v472_v16 = vlaneseq  ;;  %v1395_v46 = vmov 0  }
  0xd7   : > { %v924_v4 = vpack.c.bf16 %v381_v2, %v379_v1  ;;  %v380_v5 = vld [vmem:[%s1787_s24 + $0x10] sm:$0xff]  ;;  %v383_v6 = vld [vmem:[%s1787_s24 + $0x28] sm:$0xff]  ;;  %v385_v7 = vld [vmem:[%s1787_s24 + $0x38] sm:$0xff]  ;;  %457 = vmatprep.mubr.f32.mxu0 %v1394_v8  ;;  %463 = vmatprep.mubr.f32.mxu1 %v1394_v8  ;;  %v1396_v47 = vmov 1966171168   ;;  %vm697_vm2 = vcmask 130112  }
  0xd8   : > { %v926_v9 = vpack.c.bf16 %v380_v5, %v378_v3  ;;  %v928_v10 = vpack.c.bf16 %v385_v7, %v383_v6  ;;  %v382_v11 = vld [vmem:[%s1787_s24 + $0x20] sm:$0xff]  ;;  %v384_v12 = vld [vmem:[%s1787_s24 + $0x30] sm:$0xff]  ;;  %v377_v15 = vld [vmem:[%s1776_s29 + $0x8] sm:$0xff]  ;;  %v1820_v17 = vshrl.u32 %v472_v16, 7  ;;  %1086 = vset.pattern.permute.xlu1 %v1395_v46  ;;  %1087 = vset.pattern.permute.xlu0 %v1395_v46  ;;  %v587_v48 = vunpack.c.l.s4 %v1396_v47  ;;  %s2007_s9 = sld [smem:[#allocation21_spill]] }
  0xd9   : > { %925 = vmatprep.subr.bf16.mxu0 %v924_v4  ;;  %932 = vmatprep.subr.bf16.mxu1 %v924_v4  ;;  %v930_v13 = vpack.c.bf16 %v384_v12, %v382_v11  ;;  %v376_v14 = vld [vmem:[%s1776_s29] sm:$0xff]  ;;  %v917_v40 = vld [vmem:[%s328_s16] ss:$0 sm:$0xff]  ;;  %vm715_vm3 = vcmask 122880  }
  0xda   : > { %927 = vmatpush1.bf16.msra.mxu0 %v926_v9  ;;  %934 = vmatpush1.bf16.msra.mxu1 %v926_v9  ;;  %v1823_v18 = vsub.s32 1, %v1820_v17  ;;  %v470_v19 = vld [vmem:[%s320_s28] sm:$0x3]  ;;  %v1829_v29 = vsub.s32 0, %v1820_v17  ;;  %v588_v49 = vunpack.c.0.s8 %v587_v48  ;;  %v528_v50 = vsub.s32 2, %v1820_v17 }
  0xdb   : > { %929 = vmatprep.subr.bf16.mxu0 %v928_v10  ;;  %933 = vmatprep.subr.bf16.mxu1 %v928_v10  ;;  %v532_v51 = vsub.s32 3, %v1820_v17  ;;  %v536_v52 = vsub.s32 4, %v1820_v17  ;;  %v540_v53 = vsub.s32 5, %v1820_v17  ;;  %v544_v54 = vsub.s32 6, %v1820_v17 }
  0xdc   : > { %v479_v20 = vrot.slane %v470_v19, %v1823_v18  ;;  %v475_v30 = vrot.slane %v470_v19, %v1829_v29  ;;  %v548_v55 = vsub.s32 7, %v1820_v17  ;;  %v591_v57 = vsub.s32 %v588_v49, %v1820_v17  ;;  %v502_v49 = vld [vmem:[#allocation2] sm:$0x1] }
  0xde   : > { %931 = vmatpush1.bf16.msra.mxu0 %v930_v13  ;;  %935 = vmatpush1.bf16.msra.mxu1 %v930_v13  ;;  %p918_p7 = scmp.ne.s32.totalorder %s2007_s9, 1 }
  0xdf   : > { %s722_s29 = sld [smem:[#allocation3]] (!%p918_p7) }
  0xe1   : > { %913 = vmatmul.mubr.msk.f32.vlgmr.msra.gmra.mrb[0].mxu0 %vm386_vm1, %v376_v14  ;;  %914 = vmatmul.mubr.msk.f32.vlgmr.msra.gmra.mrb[0].mxu1 %vm386_vm1, %v377_v15 }
 0x1b4   : > { %v459_v21 = vpop.f32.mrb[0].mxu0  ;;  %v465_v22 = vpop.f32.mrb[0].mxu1 }
 0x1b5   : > { %v461_v23 = vpop.f32.mrb[1].mxu0  ;;  %v467_v24 = vpop.f32.mrb[1].mxu1  ;;  %v482_v31 = vadd.f32 %v475_v30, %v459_v21  ;;  %v484_v32 = vadd.f32 %v475_v30, %v465_v22 }
 0x1b6   : > { %v483_v25 = vadd.f32 %v479_v20, %v461_v23  ;;  %v485_v26 = vadd.f32 %v479_v20, %v467_v24 }
 0x1b8   : > { %v915_v27 = vmul.f32 -1.442695, %v483_v25  ;;  %v916_v28 = vmul.f32 -1.442695, %v485_v26 }
 0x1ba   : > { %1088 = vpow2.f32 %v915_v27 }
 0x1bb   : > { %1090 = vpow2.f32 %v916_v28 }
 0x1bc   : > { %1092 = vtanh.f32 %v482_v31 }
 0x1bd   : > { %1094 = vtanh.f32 %v484_v32 }
 0x1c4   : > { %v1089_v33 = vpop.eup %1088 }
 0x1c5   : > { %v1091_v34 = vpop.eup %1090  ;;  %v494_v35 = vadd.f32 1.0, %v1089_v33 }
 0x1c6   : > { %v495_v36 = vadd.f32 1.0, %v1091_v34  ;;  %v1093_v37 = vpop.eup %1092 }
 0x1c7   : > { %1096 = vrcp.f32 %v494_v35  ;;  %v1095_v38 = vpop.eup %1094 }
 0x1c8   : > { %1098 = vrcp.f32 %v495_v36 }
 0x1d1   : > { %v1097_v39 = vpop.eup %1096 }
 0x1d2   : > { %v1099_v41 = vpop.eup %1098  ;;  %v500_v42 = vmul.f32 %v1097_v39, %v1093_v37  ;;  %v687_v39 = vand.u32 127, %v472_v16 }
 0x1d3   : > { %v501_v43 = vmul.f32 %v1099_v41, %v1095_v38 }
 0x1d4   : > { %v510_v44 = vmul.f32 %v917_v40, %v500_v42  ;;  %v690_v42 = vsub.s32 %v687_v39, %v1820_v17 }
 0x1d5   : > { %v511_v45 = vmul.f32 %v917_v40, %v501_v43  ;;  %v692_v40 = vadd.s32 4294967288, %v687_v39 }
 0x1d6   : > { %512 = vadd.xlane.f32.xlu0 %v510_v44 }
 0x1d7   : > { %v695_v43 = vsub.s32 %v692_v40, %v1820_v17 }
 0x1da   : > { %514 = vadd.xlane.f32.xlu0 %v511_v45 }
 0x263   : > { %v513_v56 = vpop.xlane.xlu0 %512 }
 0x264   : > { %v521_v58 = vrot.slane %v513_v56, %v1829_v29  ;;  %v525_v59 = vrot.slane %v513_v56, %v1823_v18  ;;  %v529_v60 = vrot.slane %v513_v56, %v528_v50  ;;  %v533_v61 = vrot.slane %v513_v56, %v532_v51 }
 0x265   : > { %v537_v62 = vrot.slane %v513_v56, %v536_v52  ;;  %v541_v63 = vrot.slane %v513_v56, %v540_v53  ;;  %v545_v0 = vrot.slane %v513_v56, %v544_v54  ;;  %v549_v1 = vrot.slane %v513_v56, %v548_v55 }
 0x266   : > { %v582_v2 = vcombine.low %v521_v58, %v525_v59  ;;  %v583_v3 = vcombine.low %v529_v60, %v533_v61 }
 0x267   : > { %v515_v4 = vpop.xlane.xlu0 %514  ;;  %v584_v5 = vcombine.low %v537_v62, %v541_v63  ;;  %v585_v6 = vcombine.low %v545_v0, %v549_v1 }
 0x268   : > { %v592_v7 = vrot.slane %v582_v2, %v591_v57  ;;  %v599_v8 = vrot.slane %v583_v3, %v591_v57  ;;  %v553_v9 = vrot.slane %v515_v4, %v1829_v29  ;;  %v557_v10 = vrot.slane %v515_v4, %v1823_v18 }
 0x269   : > { %v606_v11 = vrot.slane %v584_v5, %v591_v57  ;;  %v613_v12 = vrot.slane %v585_v6, %v591_v57  ;;  %v561_v13 = vrot.slane %v515_v4, %v528_v50  ;;  %v565_v14 = vrot.slane %v515_v4, %v532_v51 }
 0x26a   : > { %v614_v15 = vcombine.low %v592_v7, %v599_v8  ;;  %v569_v19 = vrot.slane %v515_v4, %v536_v52  ;;  %v573_v20 = vrot.slane %v515_v4, %v540_v53  ;;  %v577_v21 = vrot.slane %v515_v4, %v544_v54 }
 0x26b   : > { %v615_v22 = vcombine.low %v606_v11, %v613_v12  ;;  %v581_v23 = vrot.slane %v515_v4, %v548_v55  ;;  %v631_v24 = vcombine.low %v553_v9, %v557_v10  ;;  %v632_v25 = vcombine.low %v561_v13, %v565_v14 }
 0x26c   : > { %v622_v26 = vrot.slane %v614_v15, %v591_v57  ;;  %v633_v27 = vcombine.low %v569_v19, %v573_v20  ;;  %v723_v52 = vstv (!%p918_p7), %s722_s29 }
 0x26d   : > { %v629_v28 = vrot.slane %v615_v22, %v591_v57  ;;  %v634_v30 = vcombine.low %v577_v21, %v581_v23  ;;  %v641_v31 = vrot.slane %v631_v24, %v591_v57  ;;  %v648_v29 = vrot.slane %v632_v25, %v591_v57 }
 0x26e   : > { %v655_v32 = vrot.slane %v633_v27, %v591_v57 }
 0x26f   : > { %v630_v18 = vcombine.low %v622_v26, %v629_v28  ;;  %v662_v33 = vrot.slane %v634_v30, %v591_v57  ;;  %v663_v34 = vcombine.low %v641_v31, %v648_v29 }
 0x271   : > { %681 = vperm.xlu1 %1086, %v630_v18   ;;  %v664_v35 = vcombine.low %v655_v32, %v662_v33  ;;  %v671_v36 = vrot.slane %v663_v34, %v591_v57 }
 0x273   : > { %v678_v37 = vrot.slane %v664_v35, %v591_v57 }
 0x275   : > { %v679_v38 = vcombine.low %v671_v36, %v678_v37 }
 0x277   : > { %684 = vperm.xlu1 %1086, %v679_v38  }
 0x2f0   : > { %v682_v41 = vpop.permute.xlu1 %681 }
 0x2f1   : > { %v691_v45 = vrot.slane %v682_v41, %v690_v42 }
 0x2f6   : > { %v685_v44 = vpop.permute.xlu1 %684 }
 0x2f7   : > { %v696_v46 = vrot.slane %v685_v44, %v695_v43 }
 0x2f9   : > { %v698_v47 = vsel %vm697_vm2, %v696_v46, %v691_v45 }
 0x2fa   : > { %v705_v48 = vrot.slane %v698_v47, %v591_v57  ;;  %720 = sbr.rel (%p918_p7) target bundleno = 1093 (0x445), region = 64 }
 0x2fc   : > { %v712_v50 = vrot.slane %v705_v48, %v591_v57 }
 0x2fe   : > { %v714_v51 = vadd.f32 %v712_v50, %v502_v49 }
 0x300   : > { %716 = vst.msk [vmem:[#allocation2] sm:$0x1] %vm715_vm3, %v714_v51 }
 0x307   : > { %v721_v16 = vld [vmem:[#allocation2] sm:$0x1] }
 0x308   : > { %v724_v17 = vadd.f32 %v723_v52, %v721_v16 }
 0x30a   : > { %v725_v53 = vsel %vm715_vm3, %v724_v17, -inf }
 0x30b   : > { %726 = vmax.xlane.f32.xlu0 %v725_v53 }
 0x398   : > { %v727_v54 = vpop.xlane.xlu0 %726 }
 0x399   : > { %v728_v55 = vsub.f32 %v724_v17, %v727_v54 }
 0x39b   : > { %v729_v56 = vmul.f32 1.442695, %v728_v55 }
 0x39d   : > { %1100 = vpow2.f32 %v729_v56 }
 0x3a7   : > { %v1101_v57 = vpop.eup %1100 }
 0x3a8   : > { %v731_v58 = vsel %vm715_vm3, %v1101_v57, 0.0 }
 0x3a9   : > { %732 = vadd.xlane.f32.xlu0 %v731_v58 }
 0x436   : > { %v733_v59 = vpop.xlane.xlu0 %732 }
 0x437   : > { %1102 = vrcp.f32 %v733_v59 }
 0x441   : > { %v1103_v60 = vpop.eup %1102 }
 0x442   : > { %v735_v61 = vmul.f32 %v1103_v60, %v1101_v57 }
 0x444   : > { %736 = vst.msk [vmem:[%s367_s23] sm:$0x1] %vm715_vm3, %v735_v61 }
 0x445 PF: > { %s2008_s10 = sld [smem:[#allocation22_spill]]  ;;  %s2009_s11 = sld [smem:[#allocation30_spill]] }
 0x446   : > { %s750_s24 = sshll.u32 %s367_s23, 4  ;;  %s738_s20 = scalar_lea.sflag [#allocation6], %s1772_s8  ;;  %s751_s24 = int_to_ptr.vmem [resolvable:$true] %s750_s24 }
 0x447   : > { %s1224_s4 = scalar_lea.vmem %s751_s24, 16  ;;  %p2010_p4 = scmp.ne.s32.totalorder %s1982_s18, 0 }
 0x448   : > { %p1225_p6 = scmp.ne.s32.totalorder %s751_s24, %s1224_s4  ;;  %s1397_s28 = smov [#allocation12]  }
 0x449   : > { %s1228_s13 = sshll.u32 %s1397_s28, 4  ;;  %s1229_s13 = int_to_ptr.vmem [resolvable:$false] %s1228_s13 }
 0x44a   : > { %p1226_p2 = pnand %p1225_p6, %p2010_p4  ;;  %s1230_s16 = scalar_lea.vmem %s1229_s13, 32 }
 0x44b   : > { %s919_s19 = sshll.u32 %s2008_s10, 4  ;;  %p1231_p3 = scmp.lt.s32.totalorder %s751_s24, %s1229_s13 }
 0x44c   : > { %s1859_s12 = scalar_lea.hbm %s2009_s11, %s919_s19  ;;  %p1227_p12 = pneg %p1226_p2 }
 0x44d   : > { %p1232_p10 = scmp.lt.s32.totalorder %s1230_s16, %s1224_s4 }
 0x44f   : > { %p1233_p11 = por %p1232_p10, %p1231_p3 }
 0x451   : > { %p1234_p13 = pnand %p1233_p11, %p1227_p12 }
 0x453   : > { %1237 = shalt.err (!%p1234_p13)
}
 0x454   : > { %s1238_s8 = scalar_lea.hbm %s1859_s12, 16  ;;  %s1242_s9 = scalar_lea.hbm %s2009_s11, 32 }
 0x455   : > { %p1239_p9 = scmp.ne.s32.totalorder %s1859_s12, %s1238_s8  ;;  %p1243_p1 = scmp.lt.u32.totalorder %s1859_s12, %s2009_s11 }
 0x456   : > { %p1244_p0 = scmp.lt.u32.totalorder %s1242_s9, %s1238_s8  ;;  %p1246_p6 = scmp.lt.u32.totalorder %s1238_s8, %s1859_s12 }
 0x457   : > { %p1240_p5 = pnand %p1239_p9, %p2010_p4 }
 0x458   : > { %p1245_p7 = por %p1244_p0, %p1243_p1 }
 0x459   : > { %p1241_p8 = pneg %p1240_p5 }
 0x45a   : > { %p1247_p2 = por %p1246_p6, %p1245_p7 }
 0x45c   : > { %p1248_p12 = pnand %p1247_p2, %p1241_p8 }
 0x45e   : > { %1251 = shalt.err (!%p1248_p12)
}
 0x45f   : > { %944 = dma.vmem_to_hbm [thread:$0]  (%p2010_p4), %s751_s24, 16, %s1859_s12, %s738_s20  }
 0x460 PF: > { %s2011_s19 = sld [smem:[#allocation19_spill]]  ;;  %s2012_s5 = sld [smem:[#allocation28_spill]] }
 0x461   : > { %p964_p3 = scmp.ge.s32.totalorder %s1382_s7, 2 }
 0x466   : > { %s762_s14 = sand.u32 1, %s2011_s19   ;;  %p2013_p10 = scmp.ne.s32.totalorder %s2012_s5, 0 }
 0x467   : > { %s763_s4 = scalar_lea.sflag [#allocation6], %s762_s14 }
 0x468   : > { %p960_p11 = pnand %p964_p3, %p2013_p10 }
 0x46a   : > { %1325 = dma.done.wait (!%p960_p11), %s763_s4, 16  }
 0x46b   : > { %1327 = vsyncadd (!%p960_p11), %s763_s4, 4294967280  ;;  %s28_s7 = sadd.s32 1, %s1382_s7   ;;  %s2015_s23 = sld [smem:[#allocation18_spill]] }
 0x46c   : > { %p1886_p13 = scmp.ge.s32.totalorder %s28_s7, 6   ;;  %s2016_s18 = sld [smem:[#allocation20_spill]] }
 0x46d   : > { %s2017_s12 = sld [smem:[#allocation27_spill]]  ;;  %s2018_s13 = sld [smem:[#allocation24_spill]] }
 0x46e   : > { %s2020_s20 = smov %s1334_s21  ;;  %s2021_s21 = smov %s1338_s22 }
 0x46f   : > { %s2022_s22 = smov %s1700_s27  ;;  %s2023_s24 = smov %s1350_s25 }
 0x470   : > { %s2024_s25 = smov %s1697_s15  ;;  %s2025_s4 = smov %s1358_s26 }
 0x471   : > { %s2028_s28 = smov %s1374_s30  ;;  %s2029_s29 = smov %s1378_s6 }
 0x472   : > { %s2026_s26 = smov %s2016_s18  ;;  %s2030_s30 = smov %s2037_s17 }
 0x473   : > { %s2027_s27 = smov %s2017_s12  ;;  %s2031_s6 = smov %s2018_s13 }
 0x474   :  { %27 = sbr.rel (!%p1886_p13) target bundleno = 18 (0x12), region = 130 }
 0x47b   :  { %767 = vsyncpa [#allocation5], 1 }
 0x47c   :  { %769 = vsyncpa [#allocation5 + $0x1], 1 }
 0x47d   :  { %770 = vsyncpa [#allocation8], 1 }
 0x47e   :  { %772 = vsyncpa [#allocation8 + $0x1], 1 }
 0x47f   :  { %773 = vsyncpa [#allocation11], 1 }
 0x480   :  { %775 = vsyncpa [#allocation11 + $0x1], 1 }
 0x481   :  { %776 = vsyncpa [#allocation6], 1 }
 0x482   :  { %778 = vsyncpa [#allocation6 + $0x1], 1 }

</bundles_post_ra>
